<compile_context>
chip_gen: v7x
topology: tpu7x:2x2x1
jax: 0.10.0
libtpu: 0.0.40
codegen_flags: <defaults>
</compile_context>

<pallas_src>
import functools

import jax
import jax.numpy as jnp
from jax.experimental import pallas as pl
from jax.experimental.pallas import tpu as pltpu

LANE = 128
SUBLANE = 8


def _round_up(n, m):
    return ((n + m - 1) // m) * m


def _mlp_kernel(x_ref, w1_ref, b1_ref, w2_ref, b2_ref, w3_ref, b3_ref, o_ref,
                *, n_classes, transpose_out):
    # In-kernel bf16 cast of the f32 activation tile (VPU, hidden under HBM).
    x = x_ref[...].astype(jnp.bfloat16)
    # Layer 1: Linear(256 -> 128) + ReLU (bf16 matmul, f32 accumulate).
    h1 = jnp.dot(x, w1_ref[...], preferred_element_type=jnp.float32)
    h1 = jnp.maximum(h1 + b1_ref[...], 0.0)
    # Layer 2: Linear(128 -> 64, zero-padded to 128 lanes) + ReLU.
    h2 = jnp.dot(h1.astype(jnp.bfloat16), w2_ref[...],
                 preferred_element_type=jnp.float32)
    h2 = jnp.maximum(h2 + b2_ref[...], 0.0)
    # Layer 3: Linear(64 -> 2), weights zero-padded to (128, 128); real logits
    # live in columns [:n_classes], padded columns are exactly zero.
    o = jnp.dot(h2.astype(jnp.bfloat16), w3_ref[...],
                preferred_element_type=jnp.float32)
    o = o + b3_ref[...]
    if transpose_out:
        # (TB, 128) -> (128, TB) XLU transpose (free slot); keep the real
        # classes only, so the HBM store is n_classes * 4 bytes per batch row.
        o_ref[...] = o.T[:n_classes, :]
    else:
        o_ref[...] = o


def prober_forward(x, params, *, tb=2048):
    """x: (B, ...) flattened row-major to (B, 256). Returns (B, 2) float32."""
    w1, b1, w2, b2, w3, b3 = params
    B = x.shape[0]
    x2d = x.reshape(B, -1).astype(jnp.float32)       # == x.float().view(B, -1)

    in_dim = x2d.shape[1]
    assert in_dim == w1.shape[0], f"expected flat dim {w1.shape[0]}, got {in_dim}"
    h1_dim = w1.shape[1]
    h2_dim = w2.shape[1]
    n_classes = w3.shape[1]
    h2_pad = _round_up(max(h2_dim, LANE), LANE)       # hidden 64 -> 128
    out_pad = _round_up(max(n_classes, LANE), LANE)   # in-kernel logit lanes

    # Minimal batch alignment: pad x rows only up to a sublane multiple.
    B_eff = max(_round_up(B, SUBLANE), SUBLANE)
    xf = x2d if B_eff == B else jnp.pad(x2d, ((0, B_eff - B), (0, 0)))

    # Weight prep (tiny, one-shot): bf16 for the MXU, hidden dim padded to 128.
    w1b = w1.astype(jnp.bfloat16)
    b1f = b1.reshape(1, h1_dim).astype(jnp.float32)
    w2b = jnp.pad(w2, ((0, 0), (0, h2_pad - h2_dim))).astype(jnp.bfloat16)
    b2f = jnp.pad(b2.reshape(1, h2_dim),
                  ((0, 0), (0, h2_pad - h2_dim))).astype(jnp.float32)
    w3b = jnp.pad(w3, ((0, h2_pad - h2_dim),
                       (0, out_pad - n_classes))).astype(jnp.bfloat16)
    b3f = jnp.pad(b3.reshape(1, n_classes),
                  ((0, 0), (0, out_pad - n_classes))).astype(jnp.float32)

    transpose_out = B_eff >= LANE
    if transpose_out:
        # Big tile to amortize per-step overhead; capped so the grid has >= 2
        # steps (v7x megacore), and kept a multiple of 128 so the in-kernel
        # transpose and the lane-dense (n_classes, TB) store stay aligned.
        TB = max(LANE, min(tb, _round_up(pl.cdiv(B_eff, 2), LANE)))
        out_shape = jax.ShapeDtypeStruct((n_classes, B_eff), jnp.float32)
        out_spec = pl.BlockSpec((n_classes, TB), lambda i: (0, i))
        out_bytes = n_classes * B_eff * 4
    else:
        TB = B_eff
        out_shape = jax.ShapeDtypeStruct((B_eff, out_pad), jnp.float32)
        out_spec = pl.BlockSpec((TB, out_pad), lambda i: (i, 0))
        out_bytes = B_eff * out_pad * 4

    grid = (pl.cdiv(B_eff, TB),)
    resident = lambda a: pl.BlockSpec(a.shape, lambda i: (0, 0))

    flops = 2 * B_eff * (in_dim * h1_dim + h1_dim * h2_pad + h2_pad * out_pad)
    bytes_accessed = (xf.size * 4                        # f32 activations in
                      + (w1b.size + w2b.size + w3b.size) * 2
                      + (b1f.size + b2f.size + b3f.size) * 4
                      + out_bytes)

    kernel = functools.partial(_mlp_kernel, n_classes=n_classes,
                               transpose_out=transpose_out)
    out = pl.pallas_call(
        kernel,
        out_shape=out_shape,
        grid=grid,
        in_specs=[
            pl.BlockSpec((TB, in_dim), lambda i: (i, 0)),   # pipelined f32 x tile
            resident(w1b), resident(b1f),
            resident(w2b), resident(b2f),
            resident(w3b), resident(b3f),
        ],
        out_specs=out_spec,
        compiler_params=pltpu.CompilerParams(
            dimension_semantics=("parallel",)),
        cost_estimate=pl.CostEstimate(
            flops=flops, transcendentals=0, bytes_accessed=bytes_accessed),
    )(xf, w1b, b1f, w2b, b2f, w3b, b3f)

    # Drop batch padding / padded logit lanes and restore (B, n_classes).
    if transpose_out:
        return out[:, :B].T
    return out[:B, :n_classes]


def init_params(key, latent_dim=(256, 128, 64), n_classes=2):
    """Synthetic parameters matching the PyTorch module's shapes.

    Weights stored as (in_dim, out_dim); biases as (1, out_dim).
    """
    dims = list(latent_dim) + [n_classes]
    params = []
    for i in range(len(dims) - 1):
        key, kw, kb = jax.random.split(key, 3)
        bound = 1.0 / jnp.sqrt(dims[i])
        w = jax.random.uniform(kw, (dims[i], dims[i + 1]), jnp.float32, -bound, bound)
        b = jax.random.uniform(kb, (1, dims[i + 1]), jnp.float32, -bound, bound)
        params.extend([w, b])
    return tuple(params)


def reference_forward(x, params):
    w1, b1, w2, b2, w3, b3 = params
    x2d = x.astype(jnp.float32).reshape(x.shape[0], -1)
    h1 = jnp.maximum(x2d @ w1 + b1, 0.0)
    h2 = jnp.maximum(h1 @ w2 + b2, 0.0)
    return h2 @ w3 + b3


if __name__ == "__main__":
    key = jax.random.PRNGKey(0)
    kp, kx1, kx2 = jax.random.split(key, 3)

    params = init_params(kp)

    # Small NCHW input whose flattened size is 256 (4-channel 8x8 latent map),
    # matching latent_dim[0] of the prober. Exercises the tiny-batch path.
    x_small = jax.random.normal(kx1, (2, 4, 8, 8), dtype=jnp.float32)
    out_small = jax.block_until_ready(prober_forward(x_small, params))
    ref_small = reference_forward(x_small, params)
    assert out_small.shape == (2, 2), out_small.shape
    assert jnp.allclose(out_small, ref_small, atol=5e-2, rtol=5e-2), (
        "mismatch vs reference (small batch)")

    # Larger, non-multiple-of-tile batch: exercises the multi-step grid,
    # partial trailing tile, and the transposed lane-dense output path.
    x_big = jax.random.normal(kx2, (600, 4, 8, 8), dtype=jnp.float32)
    out_big = jax.block_until_ready(prober_forward(x_big, params))
    ref_big = reference_forward(x_big, params)
    assert out_big.shape == (600, 2), out_big.shape
    assert jnp.allclose(out_big, ref_big, atol=5e-2, rtol=5e-2), (
        "mismatch vs reference (tiled batch)")

    print("KERNEL_OK")
</pallas_src>

<mosaic_0001>
module attributes {stable_mosaic.version = 11 : i64} {
  func.func @_mlp_kernel(%arg0: i32, %arg1: memref<8x256xf32, #tpu.memory_space<vmem>>, %arg2: memref<256x128xbf16, #tpu.memory_space<vmem>>, %arg3: memref<1x128xf32, #tpu.memory_space<vmem>>, %arg4: memref<128x128xbf16, #tpu.memory_space<vmem>>, %arg5: memref<1x128xf32, #tpu.memory_space<vmem>>, %arg6: memref<128x128xbf16, #tpu.memory_space<vmem>>, %arg7: memref<1x128xf32, #tpu.memory_space<vmem>>, %arg8: memref<8x128xf32, #tpu.memory_space<vmem>>) attributes {dimension_semantics = [#tpu.dimension_semantics<parallel>], iteration_bounds = array<i64: 1>, scalar_prefetch = 0 : i64, scratch_operands = 0 : i64, tpu.core_type = #tpu.core_type<tc>, window_params = [{transform_indices = @transform_0, window_bounds = array<i64: 8, 256>}, {pipeline_mode = #tpu.pipeline_mode<synchronous>, transform_indices = @transform_1, window_bounds = array<i64: 256, 128>}, {pipeline_mode = #tpu.pipeline_mode<synchronous>, transform_indices = @transform_2, window_bounds = array<i64: 1, 128>}, {pipeline_mode = #tpu.pipeline_mode<synchronous>, transform_indices = @transform_3, window_bounds = array<i64: 128, 128>}, {pipeline_mode = #tpu.pipeline_mode<synchronous>, transform_indices = @transform_4, window_bounds = array<i64: 1, 128>}, {pipeline_mode = #tpu.pipeline_mode<synchronous>, transform_indices = @transform_5, window_bounds = array<i64: 128, 128>}, {pipeline_mode = #tpu.pipeline_mode<synchronous>, transform_indices = @transform_6, window_bounds = array<i64: 1, 128>}, {transform_indices = @transform_7, window_bounds = array<i64: 8, 128>}]} {
    %c0 = arith.constant 0 : index
    %c0_0 = arith.constant 0 : index
    %0 = vector.load %arg1[%c0, %c0_0] : memref<8x256xf32, #tpu.memory_space<vmem>>, vector<8x256xf32>
    %1 = arith.truncf %0 : vector<8x256xf32> to vector<8x256xbf16>
    %c0_1 = arith.constant 0 : index
    %c0_2 = arith.constant 0 : index
    %2 = vector.load %arg2[%c0_1, %c0_2] : memref<256x128xbf16, #tpu.memory_space<vmem>>, vector<256x128xbf16>
    %cst = arith.constant dense<0.000000e+00> : vector<8x128xf32>
    %3 = tpu.matmul %1, %2, %cst {dimension_numbers = #tpu.dot_dimension_numbers<[1], [0], [0], [1], [0, 0, 1, 1], [], []>} : vector<8x256xbf16>, vector<256x128xbf16>, vector<8x128xf32> -> vector<8x128xf32>
    %c0_3 = arith.constant 0 : index
    %c0_4 = arith.constant 0 : index
    %4 = vector.load %arg3[%c0_3, %c0_4] : memref<1x128xf32, #tpu.memory_space<vmem>>, vector<1x128xf32>
    %5 = vector.broadcast %4 : vector<1x128xf32> to vector<8x128xf32>
    %6 = arith.addf %3, %5 : vector<8x128xf32>
    %cst_5 = arith.constant 0.000000e+00 : f32
    %7 = vector.broadcast %cst_5 : f32 to vector<8x128xf32>
    %8 = arith.maximumf %6, %7 : vector<8x128xf32>
    %9 = arith.truncf %8 : vector<8x128xf32> to vector<8x128xbf16>
    %c0_6 = arith.constant 0 : index
    %c0_7 = arith.constant 0 : index
    %10 = vector.load %arg4[%c0_6, %c0_7] : memref<128x128xbf16, #tpu.memory_space<vmem>>, vector<128x128xbf16>
    %cst_8 = arith.constant dense<0.000000e+00> : vector<8x128xf32>
    %11 = tpu.matmul %9, %10, %cst_8 {dimension_numbers = #tpu.dot_dimension_numbers<[1], [0], [0], [1], [0, 0, 1, 1], [], []>} : vector<8x128xbf16>, vector<128x128xbf16>, vector<8x128xf32> -> vector<8x128xf32>
    %c0_9 = arith.constant 0 : index
    %c0_10 = arith.constant 0 : index
    %12 = vector.load %arg5[%c0_9, %c0_10] : memref<1x128xf32, #tpu.memory_space<vmem>>, vector<1x128xf32>
    %13 = vector.broadcast %12 : vector<1x128xf32> to vector<8x128xf32>
    %14 = arith.addf %11, %13 : vector<8x128xf32>
    %cst_11 = arith.constant 0.000000e+00 : f32
    %15 = vector.broadcast %cst_11 : f32 to vector<8x128xf32>
    %16 = arith.maximumf %14, %15 : vector<8x128xf32>
    %17 = arith.truncf %16 : vector<8x128xf32> to vector<8x128xbf16>
    %c0_12 = arith.constant 0 : index
    %c0_13 = arith.constant 0 : index
    %18 = vector.load %arg6[%c0_12, %c0_13] : memref<128x128xbf16, #tpu.memory_space<vmem>>, vector<128x128xbf16>
    %cst_14 = arith.constant dense<0.000000e+00> : vector<8x128xf32>
    %19 = tpu.matmul %17, %18, %cst_14 {dimension_numbers = #tpu.dot_dimension_numbers<[1], [0], [0], [1], [0, 0, 1, 1], [], []>} : vector<8x128xbf16>, vector<128x128xbf16>, vector<8x128xf32> -> vector<8x128xf32>
    %c0_15 = arith.constant 0 : index
    %c0_16 = arith.constant 0 : index
    %20 = vector.load %arg7[%c0_15, %c0_16] : memref<1x128xf32, #tpu.memory_space<vmem>>, vector<1x128xf32>
    %21 = vector.broadcast %20 : vector<1x128xf32> to vector<8x128xf32>
    %22 = arith.addf %19, %21 : vector<8x128xf32>
    %c0_17 = arith.constant 0 : index
    %c0_18 = arith.constant 0 : index
    %23 = vector.load %arg8[%c0_17, %c0_18] : memref<8x128xf32, #tpu.memory_space<vmem>>, vector<8x128xf32>
    tpu.vector_store %arg8[%c0_17, %c0_18], %22 {strides = array<i32>} : memref<8x128xf32, #tpu.memory_space<vmem>>, vector<8x128xf32>,
    return
  }
  func.func @transform_0(%arg0: i32) -> (i32, i32) {
    %c0_i32 = arith.constant 0 : i32
    %c0_i32_0 = arith.constant 0 : i32
    return %arg0, %c0_i32 : i32, i32
  }
  func.func @transform_1(%arg0: i32) -> (i32, i32) {
    %c0_i32 = arith.constant 0 : i32
    %c0_i32_0 = arith.constant 0 : i32
    %c0_i32_1 = arith.constant 0 : i32
    return %c0_i32, %c0_i32_0 : i32, i32
  }
  func.func @transform_2(%arg0: i32) -> (i32, i32) {
    %c0_i32 = arith.constant 0 : i32
    %c0_i32_0 = arith.constant 0 : i32
    %c0_i32_1 = arith.constant 0 : i32
    return %c0_i32, %c0_i32_0 : i32, i32
  }
  func.func @transform_3(%arg0: i32) -> (i32, i32) {
    %c0_i32 = arith.constant 0 : i32
    %c0_i32_0 = arith.constant 0 : i32
    %c0_i32_1 = arith.constant 0 : i32
    return %c0_i32, %c0_i32_0 : i32, i32
  }
  func.func @transform_4(%arg0: i32) -> (i32, i32) {
    %c0_i32 = arith.constant 0 : i32
    %c0_i32_0 = arith.constant 0 : i32
    %c0_i32_1 = arith.constant 0 : i32
    return %c0_i32, %c0_i32_0 : i32, i32
  }
  func.func @transform_5(%arg0: i32) -> (i32, i32) {
    %c0_i32 = arith.constant 0 : i32
    %c0_i32_0 = arith.constant 0 : i32
    %c0_i32_1 = arith.constant 0 : i32
    return %c0_i32, %c0_i32_0 : i32, i32
  }
  func.func @transform_6(%arg0: i32) -> (i32, i32) {
    %c0_i32 = arith.constant 0 : i32
    %c0_i32_0 = arith.constant 0 : i32
    %c0_i32_1 = arith.constant 0 : i32
    return %c0_i32, %c0_i32_0 : i32, i32
  }
  func.func @transform_7(%arg0: i32) -> (i32, i32) {
    %c0_i32 = arith.constant 0 : i32
    %c0_i32_0 = arith.constant 0 : i32
    return %arg0, %c0_i32 : i32, i32
  }
}

</mosaic_0001>

<bundles_post_ra>
// kernel: tpu_custom_call.1
= control target key start
LH: loop header
LB: loop body
LE: loop exit
PB: predicated region body
PF: predicated region fallthrough
CT: control target
= control target key end

     0   :  { %12 = vsyncpa [#allocation3], 0  ;;  %s923_s0 = inlined_call_operand.hbm [shape: f32[8,256], index: 0, kind: input, shape index: {}]   ;;  %s924_s1 = inlined_call_operand.hbm [shape: bf16[256,128], index: 1, kind: input, shape index: {}]   ;;  %s925_s2 = inlined_call_operand.vmem [shape: f32[1,128], index: 2, kind: input, shape index: {}]   ;;  %s926_s3 = inlined_call_operand.hbm [shape: bf16[128,128], index: 3, kind: input, shape index: {}]   ;;  %s927_s4 = inlined_call_operand.vmem [shape: f32[1,128], index: 4, kind: input, shape index: {}]   ;;  %s928_s5 = inlined_call_operand.hbm [shape: bf16[128,128], index: 5, kind: input, shape index: {}]   ;;  %s929_s6 = inlined_call_operand.vmem [shape: f32[1,128], index: 6, kind: input, shape index: {}]   ;;  %s930_s7 = inlined_call_operand.hbm [shape: f32[8,128], index: 7, kind: output, shape index: {}]  }
   0x1   :  { %13 = vsyncpa [#allocation6], 0 }
   0x2   :  { %14 = vsyncpa [#allocation9], 0 }
   0x3   :  { %15 = vsyncpa [#allocation4], 0  ;;  %s778_s24 = smov [#allocation5]   ;;  %s660_s28 = scalar_lea.hbm %s924_s1, 2048 }
   0x4   :  { %s31_s25 = sshll.u32 %s778_s24, 4  ;;  %p661_p0 = scmp.ne.s32.totalorder %s924_s1, %s660_s28  ;;  %s32_s25 = int_to_ptr.vmem [resolvable:$true] %s31_s25 }
   0x5   :  { %p664_p1 = scmp.lt.u32.totalorder %s660_s28, %s924_s1 }
   0x7   :  { %p666_p2 = pnand %p664_p1, %p661_p0 }
   0x9   :  { %669 = shalt.err (!%p666_p2)
}
   0xa   :  { %s670_s10 = scalar_lea.vmem %s32_s25, 2048  ;;  %p675_p4 = scmp.lt.s32.totalorder %s32_s25, %s32_s25 }
   0xb   :  { %p671_p3 = scmp.ne.s32.totalorder %s32_s25, %s670_s10  ;;  %p676_p5 = scmp.lt.s32.totalorder %s670_s10, %s670_s10 }
   0xd   :  { %p677_p6 = por %p676_p5, %p675_p4 }
   0xf   :  { %p678_p7 = pnand %p677_p6, %p671_p3 }
  0x11   :  { %681 = shalt.err (!%p678_p7)
}
  0x12   :  { %s779_s11 = smov 64   ;;  %s780_s12 = smov 4  }
  0x13   :  { %37 = dma.hbm_to_vmem [thread:$0]  %s924_s1, 2048, %s32_s25, [#allocation6], %s779_s11, %s779_s11, %s780_s12  }
  0x14   :  { %s781_s15 = smov [#allocation2]   ;;  %s782_s17 = smov [#allocation7]  }
  0x15   :  { %s22_s16 = sshll.u32 %s781_s15, 4  ;;  %s45_s18 = sshll.u32 %s782_s17, 4  ;;  %s23_s16 = int_to_ptr.vmem [resolvable:$true] %s22_s16  ;;  %s46_s18 = int_to_ptr.vmem [resolvable:$true] %s45_s18 }
  0x16   :  { %s682_s21 = scalar_lea.hbm %s923_s0, 256 }
  0x17   :  { %p683_p8 = scmp.ne.s32.totalorder %s923_s0, %s682_s21  ;;  %p686_p9 = scmp.lt.u32.totalorder %s682_s21, %s923_s0 }
  0x19   :  { %p688_p10 = pnand %p686_p9, %p683_p8 }
  0x1b   :  { %691 = shalt.err (!%p688_p10)
}
  0x1c   :  { %s692_s1 = scalar_lea.vmem %s23_s16, 256  ;;  %p697_p12 = scmp.lt.s32.totalorder %s23_s16, %s23_s16 }
  0x1d   :  { %p693_p11 = scmp.ne.s32.totalorder %s23_s16, %s692_s1  ;;  %p698_p13 = scmp.lt.s32.totalorder %s692_s1, %s692_s1 }
  0x1f   :  { %p699_p0 = por %p698_p13, %p697_p12 }
  0x21   :  { %p700_p1 = pnand %p699_p0, %p693_p11 }
  0x23   :  { %703 = shalt.err (!%p700_p1)
}
  0x24   :  { %25 = dma.hbm_to_vmem [thread:$0]  %s923_s0, 256, %s23_s16, [#allocation3]  }
  0x25   :  { %s704_s30 = scalar_lea.hbm %s926_s3, 1024 }
  0x26   :  { %p705_p2 = scmp.ne.s32.totalorder %s926_s3, %s704_s30  ;;  %p708_p3 = scmp.lt.u32.totalorder %s704_s30, %s926_s3 }
  0x28   :  { %p710_p4 = pnand %p708_p3, %p705_p2 }
  0x2a   :  { %713 = shalt.err (!%p710_p4)
}
  0x2b   :  { %s714_s14 = scalar_lea.vmem %s46_s18, 1024  ;;  %p719_p6 = scmp.lt.s32.totalorder %s46_s18, %s46_s18 }
  0x2c   :  { %p715_p5 = scmp.ne.s32.totalorder %s46_s18, %s714_s14  ;;  %p720_p7 = scmp.lt.s32.totalorder %s714_s14, %s714_s14 }
  0x2e   :  { %p721_p8 = por %p720_p7, %p719_p6 }
  0x30   :  { %p722_p9 = pnand %p721_p8, %p715_p5 }
  0x32   :  { %725 = shalt.err (!%p722_p9)
}
  0x33   :  { %51 = dma.hbm_to_vmem [thread:$0]  %s926_s3, 1024, %s46_s18, [#allocation6], %s779_s11, %s779_s11, %s780_s12  }
  0x34   :  { %s783_s16 = smov [#allocation8]   ;;  %s726_s21 = scalar_lea.hbm %s928_s5, 1024 }
  0x35   :  { %s59_s17 = sshll.u32 %s783_s16, 4  ;;  %p727_p10 = scmp.ne.s32.totalorder %s928_s5, %s726_s21  ;;  %s60_s17 = int_to_ptr.vmem [resolvable:$true] %s59_s17 }
  0x36   :  { %p730_p11 = scmp.lt.u32.totalorder %s726_s21, %s928_s5 }
  0x38   :  { %p732_p12 = pnand %p730_p11, %p727_p10 }
  0x3a   :  { %735 = shalt.err (!%p732_p12)
}
  0x3b   :  { %s736_s1 = scalar_lea.vmem %s60_s17, 1024  ;;  %p741_p0 = scmp.lt.s32.totalorder %s60_s17, %s60_s17 }
  0x3c   :  { %p737_p13 = scmp.ne.s32.totalorder %s60_s17, %s736_s1  ;;  %p742_p1 = scmp.lt.s32.totalorder %s736_s1, %s736_s1 }
  0x3e   :  { %p743_p2 = por %p742_p1, %p741_p0 }
  0x40   :  { %p744_p3 = pnand %p743_p2, %p737_p13 }
  0x42   :  { %747 = shalt.err (!%p744_p3)
}
  0x43   :  { %65 = dma.hbm_to_vmem [thread:$0]  %s928_s5, 1024, %s60_s17, [#allocation9], %s779_s11, %s779_s11, %s780_s12  }
  0x44   :  { %770 = dma.done.wait [#allocation3], 256  }
  0x45   :  { %771 = vsyncadd [#allocation3], 4294967040 }
  0x46   :  { %772 = dma.done.wait [#allocation6], 3072  }
  0x47   :  { %773 = vsyncadd [#allocation6], 4294964224 }
  0x48   :  { %774 = dma.done.wait [#allocation9], 1024  }
  0x49   :  { %775 = vsyncadd [#allocation9], 4294966272  ;;  %v784_v0 = vmov 0.0   ;;  %v628_v1 = vld [vmem:[#allocation5 + $0x40] sm:$0xff]   ;;  %v630_v3 = vld [vmem:[#allocation5 + $0x48] sm:$0xff]   ;;  %vm785_vm0 = vmmov 0  }
  0x4a   :  { %579 = vmatprep.subr.bf16.mxu1 %v784_v0  ;;  %v629_v2 = vld [vmem:[#allocation5] sm:$0xff]   ;;  %539 = vmatprep.subr.bf16.mxu0 %v628_v1  ;;  %v631_v4 = vld [vmem:[#allocation5 + $0x8] sm:$0xff]   ;;  %v632_v5 = vld [vmem:[#allocation5 + $0x50] sm:$0xff]   ;;  %s786_s28 = smov [#allocation10]  }
  0x4b   :  { %540 = vmatpush3.bf16.msra.mxu0 %v629_v2  ;;  %v633_v6 = vld [vmem:[#allocation5 + $0x10] sm:$0xff]   ;;  %v634_v7 = vld [vmem:[#allocation5 + $0x58] sm:$0xff]   ;;  %v636_v9 = vld [vmem:[#allocation5 + $0x60] sm:$0xff]   ;;  %595 = vmatprep.mubr.msk.bf16.mxu1 %vm785_vm0, %v784_v0  ;;  %s493_s29 = sshll.u32 %s786_s28, 4  ;;  %s494_s29 = int_to_ptr.vmem [resolvable:$true] %s493_s29 }
  0x4c   :  { %541 = vmatprep.subr.bf16.mxu0 %v630_v3  ;;  %v635_v8 = vld [vmem:[#allocation5 + $0x18] sm:$0xff]   ;;  %v637_v10 = vld [vmem:[#allocation5 + $0x20] sm:$0xff]   ;;  %v638_v11 = vld [vmem:[#allocation5 + $0x68] sm:$0xff]   ;;  %p753_p5 = scmp.lt.s32.totalorder %s494_s29, %s494_s29 }
  0x4d   :  { %v82_v12 = vld [vmem:[#allocation2 + $0x8] sm:$0xff]  ;;  %v644_v14 = vld [vmem:[#allocation7] sm:$0xff]   ;;  %v639_v15 = vld [vmem:[#allocation5 + $0x28] sm:$0xff]  }
  0x4e   :  { %v84_v13 = vpack.c.bf16 %v82_v12, %v82_v12  ;;  %v640_v16 = vld [vmem:[#allocation5 + $0x70] sm:$0xff]   ;;  %580 = vmatpush3.bf16.msra.mxu1 %v644_v14  ;;  %v645_v17 = vld [vmem:[#allocation7 + $0x8] sm:$0xff]   ;;  %v642_v19 = vld [vmem:[#allocation5 + $0x78] sm:$0xff]  }
  0x4f   :  { %542 = vmatpush3.bf16.msra.mxu0 %v631_v4  ;;  %v641_v18 = vld [vmem:[#allocation5 + $0x30] sm:$0xff]   ;;  %581 = vmatprep.subr.bf16.mxu1 %v784_v0  ;;  %v643_v21 = vld [vmem:[#allocation5 + $0x38] sm:$0xff]   ;;  %v648_v25 = vld [vmem:[#allocation7 + $0x20] sm:$0xff]  }
  0x50   :  { %543 = vmatprep.subr.bf16.mxu0 %v632_v5  ;;  %252 = vmatprep.mubr.bf16.mxu0 %v84_v13  ;;  %v646_v20 = vld [vmem:[#allocation7 + $0x10] sm:$0xff]   ;;  %v647_v23 = vld [vmem:[#allocation7 + $0x18] sm:$0xff]   ;;  %v649_v26 = vld [vmem:[#allocation7 + $0x28] sm:$0xff]  }
  0x51   :  { %v81_v22 = vld [vmem:[#allocation2] sm:$0xff]  ;;  %v651_v28 = vld [vmem:[#allocation7 + $0x38] sm:$0xff]   ;;  %v652_v29 = vld [vmem:[#allocation8] sm:$0xff]  }
  0x52   :  { %582 = vmatpush3.bf16.msra.mxu1 %v645_v17  ;;  %v83_v24 = vpack.c.bf16 %v81_v22, %v81_v22  ;;  %v650_v27 = vld [vmem:[#allocation7 + $0x30] sm:$0xff]   ;;  %v653_v30 = vld [vmem:[#allocation8 + $0x8] sm:$0xff]   ;;  %v655_v32 = vld [vmem:[#allocation8 + $0x18] sm:$0xff]  }
  0x53   :  { %544 = vmatpush3.bf16.msra.mxu0 %v633_v6  ;;  %583 = vmatprep.subr.bf16.mxu1 %v784_v0  ;;  %v654_v31 = vld [vmem:[#allocation8 + $0x10] sm:$0xff]   ;;  %v656_v33 = vld [vmem:[#allocation8 + $0x20] sm:$0xff]   ;;  %v657_v34 = vld [vmem:[#allocation8 + $0x28] sm:$0xff]  }
  0x54   :  { %545 = vmatprep.subr.bf16.mxu0 %v634_v7  ;;  %v504_v36 = vld [vmem:[%s925_s2] ss:$0 sm:$0xff]  ;;  %v659_v45 = vld [vmem:[#allocation8 + $0x38] sm:$0xff]  }
  0x55   :  { %v658_v44 = vld [vmem:[#allocation8 + $0x30] sm:$0xff]  }
  0x56   :  { %584 = vmatpush3.bf16.msra.mxu1 %v646_v20  ;;  %v521_v46 = vld [vmem:[%s927_s4] ss:$0 sm:$0xff]  ;;  %s748_s4 = scalar_lea.vmem %s494_s29, 128 }
  0x57   :  { %546 = vmatpush3.bf16.msra.mxu0 %v635_v8  ;;  %585 = vmatprep.subr.bf16.mxu1 %v784_v0  ;;  %v530_v54 = vld [vmem:[%s929_s6] ss:$0 sm:$0xff]  ;;  %p749_p4 = scmp.ne.s32.totalorder %s494_s29, %s748_s4  ;;  %p754_p6 = scmp.lt.s32.totalorder %s748_s4, %s748_s4 }
  0x58   :  { %547 = vmatprep.subr.bf16.mxu0 %v636_v9 }
  0x59   :  { %p755_p7 = por %p754_p6, %p753_p5 }
  0x5a   :  { %586 = vmatpush3.bf16.msra.mxu1 %v647_v23 }
  0x5b   :  { %548 = vmatpush3.bf16.msra.mxu0 %v637_v10  ;;  %587 = vmatprep.subr.bf16.mxu1 %v784_v0  ;;  %p756_p8 = pnand %p755_p7, %p749_p4 }
  0x5c   :  { %549 = vmatprep.subr.bf16.mxu0 %v638_v11 }
  0x5e   :  { %588 = vmatpush3.bf16.msra.mxu1 %v648_v25 }
  0x5f   :  { %550 = vmatpush3.bf16.msra.mxu0 %v639_v15  ;;  %589 = vmatprep.subr.bf16.mxu1 %v784_v0 }
  0x60   :  { %551 = vmatprep.subr.bf16.mxu0 %v640_v16 }
  0x62   :  { %590 = vmatpush3.bf16.msra.mxu1 %v649_v26 }
  0x63   :  { %552 = vmatpush3.bf16.msra.mxu0 %v641_v18  ;;  %591 = vmatprep.subr.bf16.mxu1 %v784_v0 }
  0x64   :  { %553 = vmatprep.subr.bf16.mxu0 %v642_v19 }
  0x66   :  { %592 = vmatpush3.bf16.msra.mxu1 %v650_v27 }
  0x67   :  { %554 = vmatpush3.bf16.msra.mxu0 %v643_v21  ;;  %593 = vmatprep.subr.bf16.mxu1 %v784_v0 }
  0x68   :  { %599 = vmatprep.subr.bf16.mxu0 %v784_v0 }
  0x6a   :  { %253 = vmatmul.mubr.bf16.vlgmr.msra.gmra.mrb[0].mxu0 %v83_v24  ;;  %594 = vmatpush3.bf16.msra.mxu1 %v651_v28 }
  0x6b   :  { %615 = vmatprep.mubr.msk.bf16.mxu0 %vm785_vm0, %v784_v0  ;;  %600 = vmatpush3.bf16.msra.mxu0 %v652_v29 }
  0x6c   :  { %601 = vmatprep.subr.bf16.mxu0 %v784_v0 }
  0x6f   :  { %602 = vmatpush3.bf16.msra.mxu0 %v653_v30 }
  0x70   :  { %603 = vmatprep.subr.bf16.mxu0 %v784_v0 }
  0x73   :  { %604 = vmatpush3.bf16.msra.mxu0 %v654_v31 }
  0x74   :  { %605 = vmatprep.subr.bf16.mxu0 %v784_v0 }
  0x77   :  { %606 = vmatpush3.bf16.msra.mxu0 %v655_v32 }
  0x78   :  { %607 = vmatprep.subr.bf16.mxu0 %v784_v0 }
  0x7b   :  { %608 = vmatpush3.bf16.msra.mxu0 %v656_v33 }
  0x7c   :  { %609 = vmatprep.subr.bf16.mxu0 %v784_v0 }
  0x7f   :  { %610 = vmatpush3.bf16.msra.mxu0 %v657_v34 }
  0x80   :  { %611 = vmatprep.subr.bf16.mxu0 %v784_v0 }
  0x83   :  { %612 = vmatpush3.bf16.msra.mxu0 %v658_v44 }
  0x84   :  { %613 = vmatprep.subr.bf16.mxu0 %v784_v0 }
  0x87   :  { %614 = vmatpush3.bf16.msra.mxu0 %v659_v45 }
 0x13d   :  { %v555_v35 = vpop.f32.mrb[0].mxu0 }
 0x13e   :  { %v556_v37 = vpop.f32.mrb[1].mxu0 }
 0x13f   :  { %v557_v38 = vadd.f32 %v556_v37, %v555_v35  ;;  %v558_v39 = vpop.f32.mrb[2].mxu0 }
 0x140   :  { %v559_v40 = vpop.f32.mrb[3].mxu0 }
 0x141   :  { %v255_v41 = vadd.f32 %v557_v38, %v504_v36 }
 0x143   :  { %v260_v42 = vmax.f32 %v255_v41, 0.0 }
 0x145   :  { %v261_v43 = vpack.c.bf16 %v260_v42, %v260_v42 }
 0x147   :  { %596 = vmatmul.mubr.bf16.vlgmr.msra.gmra.mrb[0].mxu1 %v261_v43 }
 0x21a   :  { %v367_v47 = vpop.f32.mrb[0].mxu1 }
 0x21b   :  { %v368_v48 = vadd.f32 %v521_v46, %v367_v47  ;;  %v597_v49 = vpop.f32.mrb[1].mxu1 }
 0x21c   :  { %v370_v50 = vpop.f32.mrb[2].mxu1 }
 0x21d   :  { %v373_v51 = vmax.f32 %v368_v48, 0.0  ;;  %v598_v52 = vpop.f32.mrb[3].mxu1 }
 0x21f   :  { %v374_v53 = vpack.c.bf16 %v373_v51, %v373_v51 }
 0x221   :  { %616 = vmatmul.mubr.bf16.vlgmr.msra.gmra.mrb[4].mxu0 %v374_v53 }
 0x2f4   :  { %v480_v55 = vpop.f32.mrb[4].mxu0 }
 0x2f5   :  { %v481_v56 = vadd.f32 %v530_v54, %v480_v55  ;;  %v617_v57 = vpop.f32.mrb[5].mxu0 }
 0x2f6   :  { %v483_v58 = vpop.f32.mrb[6].mxu0 }
 0x2f7   :  { %486 = vst [vmem:[#allocation10] sm:$0xff] %v481_v56  ;;  %v618_v59 = vpop.f32.mrb[7].mxu0 }
 0x2f8   :  { %759 = shalt.err (!%p756_p8)
}
 0x2f9   :  { %s760_s6 = scalar_lea.hbm %s930_s7, 128 }
 0x2fa   :  { %p761_p9 = scmp.ne.s32.totalorder %s930_s7, %s760_s6  ;;  %p764_p10 = scmp.lt.u32.totalorder %s760_s6, %s930_s7 }
 0x2fc   :  { %p766_p11 = pnand %p764_p10, %p761_p9 }
 0x2fe   :  { %769 = shalt.err (!%p766_p11)
}
 0x2ff   :  { %496 = dma.vmem_to_hbm [thread:$0]  %s494_s29, 128, %s930_s7, [#allocation4]  }
 0x300   :  { %776 = dma.done.wait [#allocation4], 128  }
 0x301   :  { %777 = vsyncadd [#allocation4], 4294967168 }
 0x302   :  { %500 = vsyncpa [#allocation3], 1 }
 0x303   :  { %501 = vsyncpa [#allocation6], 1 }
 0x304   :  { %502 = vsyncpa [#allocation9], 1 }
 0x305   :  { %503 = vsyncpa [#allocation4], 1 }

</bundles_post_ra>
